<compile_context>
chip_gen: v5e
topology: v5e:2x2
jax: 0.10.0
libtpu: 0.0.40
codegen_flags: <defaults>
</compile_context>

<pallas_src>
import functools

import jax
import jax.numpy as jnp
from jax import lax
from jax.experimental import pallas as pl
from jax.experimental.pallas import tpu as pltpu

_LANE = 128          # TPU lane width
_SUBLANE = 8         # TPU sublane width
_MAX_TILE = 2048     # adjacency tile upper bound (amortizes per-step overhead,
                     # ~20 MiB pipeline VMEM at tm=tk=2048, d_pad=128)
_MIN_TILE = 512      # smallest tile considered when n exceeds one tile


def _round_up(x, m):
    return ((x + m - 1) // m) * m


@functools.lru_cache(maxsize=None)
def _vmem_limit_bytes():
    """Generation-aware VMEM limit: ~3/4 of per-core capacity, capped at 96 MiB.

    v5e/v6e have 128 MiB VMEM per TensorCore -> 96 MiB; v7x has 64 MiB -> 48 MiB.
    Falls back to a 48 MiB limit (safe on every generation) if the query fails.
    """
    cap = 64 * 1024 * 1024
    try:
        info = pltpu.get_tpu_info()
        cap = int(getattr(info, "vmem_capacity_bytes", cap))
    except Exception:
        pass
    return int(min(cap * 3 // 4, 96 * 1024 * 1024))


def _choose_tiling(n, max_tile=_MAX_TILE, min_tile=_MIN_TILE):
    """Return (n_pad, tile) with tile | n_pad and tile % 128 == 0.

    Padding is minimized first (adjacency HBM traffic scales with n_pad^2);
    among near-minimal paddings (<=3% extra) the largest tile is preferred to
    amortize the ~0.35us per-grid-step pipeline overhead.
    """
    n = max(int(n), 1)
    n_lane = _round_up(n, _LANE)
    if n_lane <= max_tile:
        return n_lane, n_lane                      # single tile per axis
    cands = []
    t = min_tile
    while t <= max_tile:
        cands.append((_round_up(n, t), t))
        t += _LANE
    best_pad = min(p for p, _ in cands)
    thresh = int(best_pad * 1.03)
    tile = max(t for p, t in cands if p <= thresh)
    return _round_up(n, tile), tile


def _pad2d(x, rows, cols):
    return jnp.pad(x, ((0, rows - x.shape[0]), (0, cols - x.shape[1])))


# ---------------------------------------------------------------- Pallas kernels

def _gcn_layer_kernel(adj_ref, h_ref, w_ref, o_ref, acc_ref, *,
                      apply_relu, apply_l2norm):
    """acc += A_tile @ (H_tile @ W); relu / L2 epilogue fused at the last k."""
    k = pl.program_id(1)

    @pl.when(k == 0)
    def _():
        acc_ref[...] = jnp.zeros_like(acc_ref)

    # Fused feature transform: the (tk x d_pad) @ (d_pad x d_pad) matmul is MXU
    # work that is free in this HBM-bound regime and removes the HW intermediate
    # round trip to HBM entirely (W is resident in VMEM across the whole grid).
    hw = jnp.dot(h_ref[...], w_ref[...], preferred_element_type=jnp.float32)
    acc_ref[...] += jnp.dot(adj_ref[...], hw.astype(jnp.bfloat16),
                            preferred_element_type=jnp.float32)

    @pl.when(k == pl.num_programs(1) - 1)
    def _():
        h = acc_ref[...]
        if apply_relu:
            h = jnp.maximum(h, 0.0)
        if apply_l2norm:
            # torch F.normalize(p=2, dim=-1, eps=1e-12): x / max(||x||, eps)
            ssq = jnp.sum(h * h, axis=-1, keepdims=True)
            h = h * lax.rsqrt(jnp.maximum(ssq, 1e-24))
        o_ref[...] = h.astype(o_ref.dtype)


def gcn_layer(adj_bf16, h_bf16, w_bf16, *, apply_relu, apply_l2norm,
              out_dtype, tm, tk):
    """One fused GCN layer: act(A_norm @ (H @ W)).

    adj_bf16: (n_pad, n_pad) bf16, h_bf16: (n_pad, d_pad) bf16,
    w_bf16: (d_pad, d_pad) bf16 -> (n_pad, d_pad) out_dtype.
    """
    n_pad = adj_bf16.shape[0]
    d_pad = w_bf16.shape[1]
    kernel = functools.partial(_gcn_layer_kernel,
                               apply_relu=apply_relu,
                               apply_l2norm=apply_l2norm)
    return pl.pallas_call(
        kernel,
        out_shape=jax.ShapeDtypeStruct((n_pad, d_pad), out_dtype),
        grid=(n_pad // tm, n_pad // tk),                 # (row tiles, reduction tiles)
        in_specs=[
            pl.BlockSpec((tm, tk), lambda i, k: (i, k)),        # adjacency tile (bf16)
            pl.BlockSpec((tk, d_pad), lambda i, k: (k, 0)),     # streamed H tile (bf16)
            pl.BlockSpec((d_pad, d_pad), lambda i, k: (0, 0)),  # resident W (bf16)
        ],
        out_specs=pl.BlockSpec((tm, d_pad), lambda i, k: (i, 0)),  # resident across k
        # f32 accumulator scratch (kept, since intermediate outputs are bf16).
        scratch_shapes=[pltpu.VMEM((tm, d_pad), jnp.float32)],
        compiler_params=pltpu.CompilerParams(
            dimension_semantics=("parallel", "arbitrary"),
            vmem_limit_bytes=_vmem_limit_bytes()),
    )(adj_bf16, h_bf16, w_bf16)


def _neg_cosine_kernel(a_ref, b_ref, o_ref, *, normalize_b):
    a = a_ref[...]
    b = b_ref[...]
    if normalize_b:
        # torch: x / clamp(||x||, min=1e-10); done in f32 per streamed tile.
        b32 = b.astype(jnp.float32)
        inv = lax.rsqrt(jnp.maximum(jnp.sum(b32 * b32, axis=-1, keepdims=True),
                                    1e-20))
        b = (b32 * inv).astype(b.dtype)
    # Contract the feature dim of both operands -> no b.T materialization.
    sim = lax.dot_general(a, b, (((1,), (1,)), ((), ())),
                          preferred_element_type=jnp.float32)
    o_ref[...] = -sim


def neg_cosine_similarity(a, b, *, assume_normalized=False):
    """-cosine_similarity_nbyn(a, b); tiled over rows of b, b streamed in bf16."""
    m, d = a.shape
    n = b.shape[0]
    d_pad = _round_up(d, _LANE)
    m_pad = _round_up(m, _SUBLANE)
    n_pad, tn = _choose_tiling(n)

    if not assume_normalized:
        # a is tiny (seed rows): hoist its normalization out of the streaming loop.
        a = a / jnp.maximum(jnp.linalg.norm(a, axis=-1, keepdims=True), 1e-10)

    a_p = _pad2d(a, m_pad, d_pad).astype(jnp.bfloat16)   # tiny, resident
    b_p = _pad2d(b, n_pad, d_pad).astype(jnp.bfloat16)   # dominant HBM stream in bf16

    kernel = functools.partial(_neg_cosine_kernel,
                               normalize_b=not assume_normalized)
    out = pl.pallas_call(
        kernel,
        out_shape=jax.ShapeDtypeStruct((m_pad, n_pad), jnp.float32),
        grid=(n_pad // tn,),
        in_specs=[
            pl.BlockSpec((m_pad, d_pad), lambda j: (0, 0)),   # small a block, resident
            pl.BlockSpec((tn, d_pad), lambda j: (j, 0)),      # streamed b tile
        ],
        out_specs=pl.BlockSpec((m_pad, tn), lambda j: (0, j)),  # lane-dense output tile
        compiler_params=pltpu.CompilerParams(
            dimension_semantics=("parallel",),
            vmem_limit_bytes=_vmem_limit_bytes()),
    )(a_p, b_p)
    return out[:m, :n]


# ---------------------------------------------------------------- JAX glue (model)

def normalized_adjacency(edges, n):
    """Dense symmetric-normalized adjacency with self loops (Kipf GCN)."""
    a = jnp.zeros((n, n), jnp.float32)
    a = a.at[edges[:, 0], edges[:, 1]].set(1.0)
    a = a.at[edges[:, 1], edges[:, 0]].set(1.0)
    a = a + jnp.eye(n, dtype=jnp.float32)
    deg = jnp.sum(a, axis=1)
    d_inv_sqrt = 1.0 / jnp.sqrt(jnp.maximum(deg, 1e-12))
    return a * d_inv_sqrt[:, None] * d_inv_sqrt[None, :]


def multi_layer_gcn(adj_bf16, feats_pad, weights_bf16, *, tm, tk,
                    l2_normalize_output):
    # TODO(synk): MultiLayerGCN source is not provided in the snippet; this is a
    # standard Kipf GCN stack (relu on all but last layer, dropout is a no-op at
    # eval/predict time).
    h = feats_pad.astype(jnp.bfloat16)   # streamed operand
    n_layers = len(weights_bf16)
    for i, w in enumerate(weights_bf16):
        last = (i == n_layers - 1)
        h = gcn_layer(adj_bf16, h, w,
                      apply_relu=not last,
                      apply_l2norm=(last and l2_normalize_output),
                      # bf16 intermediates halve next layer's H stream; final f32.
                      out_dtype=jnp.float32 if last else jnp.bfloat16,
                      tm=tm, tk=tk)
    return h


def init_structure_params(key, ent_num_sr, ent_num_tg, dim, layer_num):
    total = ent_num_sr + ent_num_tg
    k_emb, *k_w = jax.random.split(key, 1 + layer_num)
    # nn.init.xavier_uniform_ on (ent_num_sr + ent_num_tg, dim)
    limit = (6.0 / (total + dim)) ** 0.5
    emb = jax.random.uniform(k_emb, (total, dim), jnp.float32, -limit, limit)
    feats_sr = emb[:ent_num_sr]
    feats_tg = emb[ent_num_sr:]
    lim_w = (6.0 / (dim + dim)) ** 0.5
    weights = [
        jax.random.uniform(k_w[i], (dim, dim), jnp.float32, -lim_w, lim_w)
        for i in range(layer_num)
    ]
    return feats_sr, feats_tg, weights


def embed_channel_forward(params, sr_ent_seeds, tg_ent_seeds):
    """EmbedChannel.forward with channels == {'structure': ...}."""
    feats_sr, feats_tg, weights, adj_sr, adj_tg = params
    n_sr, d = feats_sr.shape
    n_tg = feats_tg.shape[0]
    d_pad = _round_up(d, _LANE)
    weights_bf16 = [_pad2d(w, d_pad, d_pad).astype(jnp.bfloat16) for w in weights]

    def run_graph(adj, feats, n):
        n_pad, tile = _choose_tiling(n)
        adj_p = _pad2d(adj, n_pad, n_pad).astype(jnp.bfloat16)   # bf16 adj stream
        feats_p = _pad2d(feats, n_pad, d_pad)
        hid = multi_layer_gcn(adj_p, feats_p, weights_bf16,
                              tm=tile, tk=tile, l2_normalize_output=True)
        return hid[:n, :d]

    sr_ent_hid = run_graph(adj_sr, feats_sr, n_sr)
    tg_ent_hid = run_graph(adj_tg, feats_tg, n_tg)

    # seed gather (integer indexing) — glue in plain JAX
    sr_seed_hid = sr_ent_hid[sr_ent_seeds.astype(jnp.int32)]
    tg_seed_hid = tg_ent_hid[tg_ent_seeds.astype(jnp.int32)]
    return sr_seed_hid, tg_seed_hid, sr_ent_hid, tg_ent_hid


def embed_channel_negative_sample(params, sr_ent_seeds, tg_ent_seeds):
    sr_seed_hid, tg_seed_hid, sr_ent_hid, tg_ent_hid = embed_channel_forward(
        params, sr_ent_seeds, tg_ent_seeds)
    # Hidden states are already L2-normalized by the fused GCN epilogue and the
    # seed rows are gathered from them, so in-kernel re-normalization is skipped.
    sim_sr = neg_cosine_similarity(sr_seed_hid, sr_ent_hid, assume_normalized=True)
    sim_tg = neg_cosine_similarity(tg_seed_hid, tg_ent_hid, assume_normalized=True)
    return sim_sr, sim_tg


# ---------------------------------------------------------------- main

if __name__ == "__main__":
    key = jax.random.PRNGKey(0)
    ent_num_sr, ent_num_tg, dim, layer_num = 32, 48, 32, 2
    num_edges, num_seeds = 64, 8

    k_e_sr, k_e_tg, k_par, k_s_sr, k_s_tg = jax.random.split(key, 5)
    edges_sr = jax.random.randint(k_e_sr, (num_edges, 2), 0, ent_num_sr)
    edges_tg = jax.random.randint(k_e_tg, (num_edges, 2), 0, ent_num_tg)
    feats_sr, feats_tg, weights = init_structure_params(
        k_par, ent_num_sr, ent_num_tg, dim, layer_num)
    adj_sr = normalized_adjacency(edges_sr, ent_num_sr)
    adj_tg = normalized_adjacency(edges_tg, ent_num_tg)

    sr_ent_seeds = jax.random.randint(k_s_sr, (num_seeds,), 0, ent_num_sr)
    tg_ent_seeds = jax.random.randint(k_s_tg, (num_seeds,), 0, ent_num_tg)

    params = (feats_sr, feats_tg, weights, adj_sr, adj_tg)

    sr_seed_hid, tg_seed_hid, sr_ent_hid, tg_ent_hid = embed_channel_forward(
        params, sr_ent_seeds, tg_ent_seeds)
    sim_sr, sim_tg = embed_channel_negative_sample(params, sr_ent_seeds, tg_ent_seeds)

    jax.block_until_ready((sr_seed_hid, tg_seed_hid, sr_ent_hid, tg_ent_hid,
                           sim_sr, sim_tg))

    assert sr_seed_hid.shape == (num_seeds, dim)
    assert tg_seed_hid.shape == (num_seeds, dim)
    assert sr_ent_hid.shape == (ent_num_sr, dim)
    assert tg_ent_hid.shape == (ent_num_tg, dim)
    assert sim_sr.shape == (num_seeds, ent_num_sr)
    assert sim_tg.shape == (num_seeds, ent_num_tg)
    # hidden rows should be unit-norm after the fused L2 epilogue
    assert jnp.allclose(jnp.linalg.norm(sr_ent_hid, axis=-1), 1.0, atol=1e-2)
    assert jnp.allclose(jnp.linalg.norm(tg_ent_hid, axis=-1), 1.0, atol=1e-2)
    print("KERNEL_OK")
</pallas_src>

<mosaic_0001>
module attributes {stable_mosaic.version = 11 : i64} {
  func.func @_gcn_layer_kernel(%arg0: i32, %arg1: i32, %arg2: memref<128x128xbf16, #tpu.memory_space<vmem>>, %arg3: memref<128x128xbf16, #tpu.memory_space<vmem>>, %arg4: memref<128x128xbf16, #tpu.memory_space<vmem>>, %arg5: memref<128x128xbf16, #tpu.memory_space<vmem>>, %arg6: memref<128x128xf32, #tpu.memory_space<vmem>>) attributes {dimension_semantics = [#tpu.dimension_semantics<parallel>, #tpu.dimension_semantics<arbitrary>], iteration_bounds = array<i64: 1, 1>, scalar_prefetch = 0 : i64, scratch_operands = 1 : i64, tpu.core_type = #tpu.core_type<tc>, window_params = [{transform_indices = @transform_0, window_bounds = array<i64: 128, 128>}, {transform_indices = @transform_1, window_bounds = array<i64: 128, 128>}, {pipeline_mode = #tpu.pipeline_mode<synchronous>, transform_indices = @transform_2, window_bounds = array<i64: 128, 128>}, {transform_indices = @transform_3, window_bounds = array<i64: 128, 128>}]} {
    %c0_i32 = arith.constant 0 : i32
    %0 = arith.cmpi eq, %arg1, %c0_i32 : i32
    %1 = arith.extui %0 : i1 to i32
    %c0_i32_0 = arith.constant 0 : i32
    %2 = arith.cmpi ne, %1, %c0_i32_0 : i32
    scf.if %2 {
      %cst_13 = arith.constant 0.000000e+00 : f32
      %15 = vector.broadcast %cst_13 : f32 to vector<128x128xf32>
      %c0_14 = arith.constant 0 : index
      %c0_15 = arith.constant 0 : index
      %16 = vector.load %arg6[%c0_14, %c0_15] : memref<128x128xf32, #tpu.memory_space<vmem>>, vector<128x128xf32>
      tpu.vector_store %arg6[%c0_14, %c0_15], %15 {strides = array<i32>} : memref<128x128xf32, #tpu.memory_space<vmem>>, vector<128x128xf32>,
    } else {
    }
    %c0 = arith.constant 0 : index
    %c0_1 = arith.constant 0 : index
    %3 = vector.load %arg3[%c0, %c0_1] : memref<128x128xbf16, #tpu.memory_space<vmem>>, vector<128x128xbf16>
    %c0_2 = arith.constant 0 : index
    %c0_3 = arith.constant 0 : index
    %4 = vector.load %arg4[%c0_2, %c0_3] : memref<128x128xbf16, #tpu.memory_space<vmem>>, vector<128x128xbf16>
    %cst = arith.constant dense<0.000000e+00> : vector<128x128xf32>
    %5 = tpu.matmul %3, %4, %cst {dimension_numbers = #tpu.dot_dimension_numbers<[1], [0], [0], [1], [0, 0, 1, 1], [], []>} : vector<128x128xbf16>, vector<128x128xbf16>, vector<128x128xf32> -> vector<128x128xf32>
    %c0_4 = arith.constant 0 : index
    %c0_5 = arith.constant 0 : index
    %6 = vector.load %arg6[%c0_4, %c0_5] : memref<128x128xf32, #tpu.memory_space<vmem>>, vector<128x128xf32>
    %c0_6 = arith.constant 0 : index
    %c0_7 = arith.constant 0 : index
    %7 = vector.load %arg2[%c0_6, %c0_7] : memref<128x128xbf16, #tpu.memory_space<vmem>>, vector<128x128xbf16>
    %8 = arith.truncf %5 : vector<128x128xf32> to vector<128x128xbf16>
    %cst_8 = arith.constant dense<0.000000e+00> : vector<128x128xf32>
    %9 = tpu.matmul %7, %8, %cst_8 {dimension_numbers = #tpu.dot_dimension_numbers<[1], [0], [0], [1], [0, 0, 1, 1], [], []>} : vector<128x128xbf16>, vector<128x128xbf16>, vector<128x128xf32> -> vector<128x128xf32>
    %10 = arith.addf %6, %9 : vector<128x128xf32>
    %c0_9 = arith.constant 0 : index
    %c0_10 = arith.constant 0 : index
    %11 = vector.load %arg6[%c0_9, %c0_10] : memref<128x128xf32, #tpu.memory_space<vmem>>, vector<128x128xf32>
    tpu.vector_store %arg6[%c0_9, %c0_10], %10 {strides = array<i32>} : memref<128x128xf32, #tpu.memory_space<vmem>>, vector<128x128xf32>,
    %c0_i32_11 = arith.constant 0 : i32
    %12 = arith.cmpi eq, %arg1, %c0_i32_11 : i32
    %13 = arith.extui %12 : i1 to i32
    %c0_i32_12 = arith.constant 0 : i32
    %14 = arith.cmpi ne, %13, %c0_i32_12 : i32
    scf.if %14 {
      %c0_13 = arith.constant 0 : index
      %c0_14 = arith.constant 0 : index
      %15 = vector.load %arg6[%c0_13, %c0_14] : memref<128x128xf32, #tpu.memory_space<vmem>>, vector<128x128xf32>
      %cst_15 = arith.constant 0.000000e+00 : f32
      %16 = vector.broadcast %cst_15 : f32 to vector<128x128xf32>
      %17 = arith.maximumf %15, %16 : vector<128x128xf32>
      %18 = arith.truncf %17 : vector<128x128xf32> to vector<128x128xbf16>
      %c0_16 = arith.constant 0 : index
      %c0_17 = arith.constant 0 : index
      %19 = vector.load %arg5[%c0_16, %c0_17] : memref<128x128xbf16, #tpu.memory_space<vmem>>, vector<128x128xbf16>
      tpu.vector_store %arg5[%c0_16, %c0_17], %18 {strides = array<i32>} : memref<128x128xbf16, #tpu.memory_space<vmem>>, vector<128x128xbf16>,
    } else {
    }
    return
  }
  func.func @transform_0(%arg0: i32, %arg1: i32) -> (i32, i32) {
    %c0_i32 = arith.constant 0 : i32
    return %arg0, %arg1 : i32, i32
  }
  func.func @transform_1(%arg0: i32, %arg1: i32) -> (i32, i32) {
    %c0_i32 = arith.constant 0 : i32
    %c0_i32_0 = arith.constant 0 : i32
    return %arg1, %c0_i32 : i32, i32
  }
  func.func @transform_2(%arg0: i32, %arg1: i32) -> (i32, i32) {
    %c0_i32 = arith.constant 0 : i32
    %c0_i32_0 = arith.constant 0 : i32
    %c0_i32_1 = arith.constant 0 : i32
    return %c0_i32, %c0_i32_0 : i32, i32
  }
  func.func @transform_3(%arg0: i32, %arg1: i32) -> (i32, i32) {
    %c0_i32 = arith.constant 0 : i32
    %c0_i32_0 = arith.constant 0 : i32
    return %arg0, %c0_i32 : i32, i32
  }
}

</mosaic_0001>

<bundles_post_ra>
// kernel: tpu_custom_call.1
= control target key start
LH: loop header
LB: loop body
LE: loop exit
PB: predicated region body
PF: predicated region fallthrough
CT: control target
= control target key end

     0   :  { %8 = vsyncpa [#allocation4], 0  ;;  %s856_s0 = inlined_call_operand.hbm [shape: bf16[128,128], index: 0, kind: input, shape index: {}]   ;;  %s857_s1 = inlined_call_operand.hbm [shape: bf16[128,128], index: 1, kind: input, shape index: {}]   ;;  %s858_s2 = inlined_call_operand.hbm [shape: bf16[128,128], index: 2, kind: input, shape index: {}]   ;;  %s859_s3 = inlined_call_operand.hbm [shape: bf16[128,128], index: 3, kind: output, shape index: {}]  }
   0x1   :  { %9 = vsyncpa [#allocation7], 0 }
   0x2   :  { %10 = vsyncpa [#allocation5], 0  ;;  %s28_s14 = sshll.u32 %s857_s1, 4  ;;  %s806_s15 = smov [#allocation6]   ;;  %s29_s14 = int_to_ptr.hbm [resolvable:$true] %s28_s14 }
   0x3   :  { %s30_s16 = sshll.u32 %s806_s15, 4  ;;  %s15_s19 = sshll.u32 %s856_s0, 4  ;;  %s31_s16 = int_to_ptr.vmem [resolvable:$true] %s30_s16  ;;  %s16_s19 = int_to_ptr.hbm [resolvable:$true] %s15_s19 }
   0x4   :  { %s807_s20 = smov 64   ;;  %s808_s21 = smov 4  }
   0x5   :  { %36 = dma.hbm_to_vmem [thread:$0]  %s29_s14, 1024, %s31_s16, [#allocation7], %s807_s20, %s807_s20, %s808_s21  }
   0x6   :  { %s809_s22 = smov [#allocation3]   ;;  %s41_s1 = sshll.u32 %s858_s2, 4  ;;  %s42_s1 = int_to_ptr.hbm [resolvable:$true] %s41_s1 }
   0x7   :  { %s17_s23 = sshll.u32 %s809_s22, 4  ;;  %s810_s0 = smov [#allocation8]   ;;  %s18_s23 = int_to_ptr.vmem [resolvable:$true] %s17_s23 }
   0x8   :  { %23 = dma.hbm_to_vmem [thread:$0]  %s16_s19, 1024, %s18_s23, [#allocation4], %s807_s20, %s807_s20, %s808_s21  }
   0x9   :  { %s43_s26 = sshll.u32 %s810_s0, 4  ;;  %s44_s26 = int_to_ptr.vmem [resolvable:$true] %s43_s26 }
   0xa   :  { %49 = dma.hbm_to_vmem [thread:$0]  %s42_s1, 1024, %s44_s26, [#allocation7], %s807_s20, %s807_s20, %s808_s21  }
   0xb   :  { %800 = dma.done.wait [#allocation4], 1024  }
   0xc   :  { %801 = vsyncadd [#allocation4], 4294966272 }
   0xd   :  { %802 = dma.done.wait [#allocation7], 2048  }
   0xe   :  { %803 = vsyncadd [#allocation7], 4294965248  ;;  %v626_v0 = vld [vmem:[#allocation8 + $0x38] sm:$0xff]  ;;  %v625_v1 = vld [vmem:[#allocation8 + $0x30] sm:$0xff]  ;;  %s811_s2 = smov [#allocation9]   ;;  %s501_s30 = sshll.u32 %s859_s3, 4  ;;  %s502_s30 = int_to_ptr.hbm [resolvable:$true] %s501_s30 }
   0xf   :  { %682 = vmatpush.bf16.msra.mxu2 %v626_v0  ;;  %210 = vmatpush.bf16.msra.mxu0 %v626_v0  ;;  %v624_v2 = vld [vmem:[#allocation8 + $0x28] sm:$0xff]  ;;  %v623_v3 = vld [vmem:[#allocation8 + $0x20] sm:$0xff]  ;;  %v622_v4 = vld [vmem:[#allocation8 + $0x18] sm:$0xff]  ;;  %s499_s27 = sshll.u32 %s811_s2, 4  ;;  %s500_s27 = int_to_ptr.vmem [resolvable:$true] %s499_s27 }
  0x10   :  { %v621_v5 = vld [vmem:[#allocation8 + $0x10] sm:$0xff]  ;;  %v620_v6 = vld [vmem:[#allocation8 + $0x8] sm:$0xff]  ;;  %v619_v7 = vld [vmem:[#allocation8] sm:$0xff] }
  0x11   :  { %v615_v8 = vld [vmem:[#allocation6 + $0x20] sm:$0xff]  ;;  %v616_v10 = vld [vmem:[#allocation6 + $0x28] sm:$0xff]  ;;  %v617_v12 = vld [vmem:[#allocation6 + $0x30] sm:$0xff] }
  0x12   :  { %v611_v9 = vld [vmem:[#allocation6] sm:$0xff]  ;;  %v612_v11 = vld [vmem:[#allocation6 + $0x8] sm:$0xff]  ;;  %v613_v13 = vld [vmem:[#allocation6 + $0x10] sm:$0xff] }
  0x13   :  { %683 = vmatpush.bf16.msra.mxu2 %v625_v1  ;;  %211 = vmatpush.bf16.msra.mxu0 %v625_v1  ;;  %v618_v14 = vld [vmem:[#allocation6 + $0x38] sm:$0xff]  ;;  %v627_v40 = vld [vmem:[#allocation3] sm:$0xff]  ;;  %v628_v42 = vld [vmem:[#allocation3 + $0x8] sm:$0xff] }
  0x14   :  { %v614_v15 = vld [vmem:[#allocation6 + $0x18] sm:$0xff]  ;;  %v631_v41 = vld [vmem:[#allocation3 + $0x20] sm:$0xff]  ;;  %v632_v43 = vld [vmem:[#allocation3 + $0x28] sm:$0xff] }
  0x15   :  { %v629_v44 = vld [vmem:[#allocation3 + $0x10] sm:$0xff]  ;;  %v630_v46 = vld [vmem:[#allocation3 + $0x18] sm:$0xff] }
  0x16   :  { %v633_v45 = vld [vmem:[#allocation3 + $0x30] sm:$0xff]  ;;  %v634_v47 = vld [vmem:[#allocation3 + $0x38] sm:$0xff] }
  0x17   :  { %684 = vmatpush.bf16.msra.mxu2 %v624_v2  ;;  %212 = vmatpush.bf16.msra.mxu0 %v624_v2 }
  0x1b   :  { %685 = vmatpush.bf16.msra.mxu2 %v623_v3  ;;  %213 = vmatpush.bf16.msra.mxu0 %v623_v3 }
  0x1f   :  { %686 = vmatpush.bf16.msra.mxu2 %v622_v4  ;;  %214 = vmatpush.bf16.msra.mxu0 %v622_v4 }
  0x23   :  { %687 = vmatpush.bf16.msra.mxu2 %v621_v5  ;;  %215 = vmatpush.bf16.msra.mxu0 %v621_v5 }
  0x27   :  { %688 = vmatpush.bf16.msra.mxu2 %v620_v6  ;;  %216 = vmatpush.bf16.msra.mxu0 %v620_v6 }
  0x2b   :  { %689 = vmatpush.bf16.msra.mxu2 %v619_v7  ;;  %217 = vmatpush.bf16.msra.mxu0 %v619_v7 }
  0x2e   :  { %238 = vmatmul.bf16.vlgmr.msra.gmra.mxu2 %v615_v8  ;;  %218 = vmatmul.bf16.vlgmr.msra.gmra.mxu0 %v611_v9 }
  0x3e   :  { %243 = vmatmul.bf16.gmra.mxu2 %v616_v10  ;;  %223 = vmatmul.bf16.gmra.mxu0 %v612_v11 }
  0x4e   :  { %248 = vmatmul.bf16.gmra.mxu2 %v617_v12  ;;  %228 = vmatmul.bf16.gmra.mxu0 %v613_v13 }
  0x5e   :  { %253 = vmatmul.bf16.gmra.mxu2 %v618_v14  ;;  %233 = vmatmul.bf16.gmra.mxu0 %v614_v15 }
  0xab   :  { %v219_v17 = vpop.f32.mrf.mxu0 }
  0xb1   :  { %v239_v16 = vpop.f32.mrf.mxu2 }
  0xb3   :  { %v221_v19 = vpop.f32.mrf.mxu0 }
  0xb4   :  { %v291_v39 = vpack.c.bf16 %v221_v19, %v219_v17 }
  0xb9   :  { %v241_v18 = vpop.f32.mrf.mxu2 }
  0xba   :  { %v295_v34 = vpack.c.bf16 %v241_v18, %v239_v16 }
  0xbb   :  { %v224_v21 = vpop.f32.mrf.mxu0 }
  0xc1   :  { %v244_v20 = vpop.f32.mrf.mxu2 }
  0xc3   :  { %v226_v23 = vpop.f32.mrf.mxu0 }
  0xc4   :  { %v292_v38 = vpack.c.bf16 %v226_v23, %v224_v21 }
  0xc9   :  { %v246_v22 = vpop.f32.mrf.mxu2 }
  0xca   :  { %v296_v33 = vpack.c.bf16 %v246_v22, %v244_v20 }
  0xcb   :  { %v229_v25 = vpop.f32.mrf.mxu0 }
  0xd1   :  { %v249_v24 = vpop.f32.mrf.mxu2 }
  0xd3   :  { %v231_v28 = vpop.f32.mrf.mxu0 }
  0xd4   :  { %v293_v37 = vpack.c.bf16 %v231_v28, %v229_v25 }
  0xd9   :  { %v251_v26 = vpop.f32.mrf.mxu2 }
  0xda   :  { %v297_v32 = vpack.c.bf16 %v251_v26, %v249_v24 }
  0xdb   :  { %v234_v31 = vpop.f32.mrf.mxu0 }
  0xe1   :  { %v254_v27 = vpop.f32.mrf.mxu2 }
  0xe3   :  { %v236_v35 = vpop.f32.mrf.mxu0 }
  0xe4   :  { %v294_v36 = vpack.c.bf16 %v236_v35, %v234_v31 }
  0xe9   :  { %v256_v29 = vpop.f32.mrf.mxu2 }
  0xea   :  { %v298_v30 = vpack.c.bf16 %v256_v29, %v254_v27 }
  0xec   :  { %347 = vmatpush.bf16.msra.mxu1 %v298_v30  ;;  %690 = vmatpush.bf16.msra.mxu3 %v298_v30 }
  0xf0   :  { %348 = vmatpush.bf16.msra.mxu1 %v297_v32  ;;  %691 = vmatpush.bf16.msra.mxu3 %v297_v32 }
  0xf4   :  { %349 = vmatpush.bf16.msra.mxu1 %v296_v33  ;;  %692 = vmatpush.bf16.msra.mxu3 %v296_v33 }
  0xf8   :  { %350 = vmatpush.bf16.msra.mxu1 %v295_v34  ;;  %693 = vmatpush.bf16.msra.mxu3 %v295_v34 }
  0xfc   :  { %351 = vmatpush.bf16.msra.mxu1 %v294_v36  ;;  %694 = vmatpush.bf16.msra.mxu3 %v294_v36 }
 0x100   :  { %352 = vmatpush.bf16.msra.mxu1 %v293_v37  ;;  %695 = vmatpush.bf16.msra.mxu3 %v293_v37 }
 0x104   :  { %353 = vmatpush.bf16.msra.mxu1 %v292_v38  ;;  %696 = vmatpush.bf16.msra.mxu3 %v292_v38 }
 0x108   :  { %354 = vmatpush.bf16.msra.mxu1 %v291_v39  ;;  %697 = vmatpush.bf16.msra.mxu3 %v291_v39 }
 0x10b   :  { %355 = vmatmul.bf16.vlgmr.msra.gmra.mxu1 %v627_v40  ;;  %375 = vmatmul.bf16.vlgmr.msra.gmra.mxu3 %v631_v41 }
 0x11b   :  { %360 = vmatmul.bf16.gmra.mxu1 %v628_v42  ;;  %380 = vmatmul.bf16.gmra.mxu3 %v632_v43 }
 0x12b   :  { %365 = vmatmul.bf16.gmra.mxu1 %v629_v44  ;;  %385 = vmatmul.bf16.gmra.mxu3 %v633_v45 }
 0x13b   :  { %370 = vmatmul.bf16.gmra.mxu1 %v630_v46  ;;  %390 = vmatmul.bf16.gmra.mxu3 %v634_v47 }
 0x188   :  { %v356_v48 = vpop.f32.mrf.mxu1 }
 0x189   :  { %v447_v51 = vmax.f32 %v356_v48, 0.0 }
 0x18e   :  { %v376_v49 = vpop.f32.mrf.mxu3 }
 0x18f   :  { %v455_v55 = vmax.f32 %v376_v49, 0.0 }
 0x190   :  { %v358_v50 = vpop.f32.mrf.mxu1 }
 0x191   :  { %v448_v52 = vmax.f32 %v358_v50, 0.0 }
 0x193   :  { %v638_v53 = vpack.c.bf16 %v448_v52, %v447_v51 }
 0x195   :  { %639 = vst [vmem:[#allocation9] sm:$0xff] %v638_v53  }
 0x196   :  { %v378_v54 = vpop.f32.mrf.mxu3 }
 0x197   :  { %v456_v56 = vmax.f32 %v378_v54, 0.0 }
 0x198   :  { %v361_v57 = vpop.f32.mrf.mxu1 }
 0x199   :  { %v658_v58 = vpack.c.bf16 %v456_v56, %v455_v55  ;;  %v449_v61 = vmax.f32 %v361_v57, 0.0 }
 0x19b   :  { %678 = vst [vmem:[#allocation9 + $0x20] sm:$0xff] %v658_v58  }
 0x19e   :  { %v381_v59 = vpop.f32.mrf.mxu3 }
 0x19f   :  { %v457_v1 = vmax.f32 %v381_v59, 0.0 }
 0x1a0   :  { %v363_v60 = vpop.f32.mrf.mxu1 }
 0x1a1   :  { %v450_v62 = vmax.f32 %v363_v60, 0.0 }
 0x1a3   :  { %v643_v63 = vpack.c.bf16 %v450_v62, %v449_v61 }
 0x1a5   :  { %675 = vst [vmem:[#allocation9 + $0x8] sm:$0xff] %v643_v63  }
 0x1a6   :  { %v383_v0 = vpop.f32.mrf.mxu3 }
 0x1a7   :  { %v458_v2 = vmax.f32 %v383_v0, 0.0 }
 0x1a8   :  { %v366_v3 = vpop.f32.mrf.mxu1 }
 0x1a9   :  { %v663_v4 = vpack.c.bf16 %v458_v2, %v457_v1  ;;  %v451_v7 = vmax.f32 %v366_v3, 0.0 }
 0x1ab   :  { %679 = vst [vmem:[#allocation9 + $0x28] sm:$0xff] %v663_v4  }
 0x1ae   :  { %v386_v5 = vpop.f32.mrf.mxu3 }
 0x1af   :  { %v459_v11 = vmax.f32 %v386_v5, 0.0 }
 0x1b0   :  { %v368_v6 = vpop.f32.mrf.mxu1 }
 0x1b1   :  { %v452_v8 = vmax.f32 %v368_v6, 0.0 }
 0x1b3   :  { %v648_v9 = vpack.c.bf16 %v452_v8, %v451_v7 }
 0x1b5   :  { %676 = vst [vmem:[#allocation9 + $0x10] sm:$0xff] %v648_v9  }
 0x1b6   :  { %v388_v10 = vpop.f32.mrf.mxu3 }
 0x1b7   :  { %v460_v12 = vmax.f32 %v388_v10, 0.0 }
 0x1b8   :  { %v371_v13 = vpop.f32.mrf.mxu1 }
 0x1b9   :  { %v668_v14 = vpack.c.bf16 %v460_v12, %v459_v11  ;;  %v453_v17 = vmax.f32 %v371_v13, 0.0 }
 0x1bb   :  { %680 = vst [vmem:[#allocation9 + $0x30] sm:$0xff] %v668_v14  }
 0x1be   :  { %v391_v15 = vpop.f32.mrf.mxu3 }
 0x1bf   :  { %v461_v21 = vmax.f32 %v391_v15, 0.0 }
 0x1c0   :  { %v373_v16 = vpop.f32.mrf.mxu1 }
 0x1c1   :  { %v454_v18 = vmax.f32 %v373_v16, 0.0 }
 0x1c3   :  { %v653_v19 = vpack.c.bf16 %v454_v18, %v453_v17 }
 0x1c5   :  { %677 = vst [vmem:[#allocation9 + $0x18] sm:$0xff] %v653_v19  }
 0x1c6   :  { %v393_v20 = vpop.f32.mrf.mxu3 }
 0x1c7   :  { %v462_v22 = vmax.f32 %v393_v20, 0.0 }
 0x1c9   :  { %v673_v23 = vpack.c.bf16 %v462_v22, %v461_v21 }
 0x1cb   :  { %681 = vst [vmem:[#allocation9 + $0x38] sm:$0xff] %v673_v23  }
 0x1cc   :  { %507 = dma.vmem_to_hbm [thread:$0]  %s500_s27, 1024, %s502_s30, [#allocation5], %s807_s20, %s807_s20, %s808_s21  }
 0x1cd   :  { %804 = dma.done.wait [#allocation5], 1024  }
 0x1ce   :  { %805 = vsyncadd [#allocation5], 4294966272 }
 0x1cf   :  { %512 = vsyncpa [#allocation4], 1 }
 0x1d0   :  { %513 = vsyncpa [#allocation7], 1 }
 0x1d1   :  { %514 = vsyncpa [#allocation5], 1 }

</bundles_post_ra>
